<compile_context>
chip_gen: v7x
topology: tpu7x:2x2x1
jax: 0.10.0
libtpu: 0.0.40
codegen_flags: <defaults>
</compile_context>

<pallas_src>
import math
import jax
import jax.numpy as jnp
from jax.experimental import pallas as pl
from jax.experimental.pallas import tpu as pltpu


def _mlp_kernel(x_ref, w1_ref, b1_ref, w2_ref, o_ref):
    # x_ref:  (TM, D_in)        bf16 tile of aggregated node embeddings
    # w1_ref: (D_in, H)         bf16 first linear weight   (full, resident)
    # b1_ref: (1, H)            f32  first linear bias     (full, resident)
    # w2_ref: (H, D_out_pad)    bf16 second linear weight  (full, resident)
    # o_ref:  (TM, D_out_pad)   f32  output tile (lane-dense, >=128 wide)
    h = jnp.dot(x_ref[...], w1_ref[...], preferred_element_type=jnp.float32)
    h = jnp.maximum(h + b1_ref[...], 0.0)          # f32 bias-add + ReLU
    o_ref[...] = jnp.dot(h.astype(w2_ref.dtype), w2_ref[...],
                         preferred_element_type=jnp.float32).astype(o_ref.dtype)


def _round_up(x, m):
    return ((x + m - 1) // m) * m


def _pick_tm(n_pad8, tm_max):
    """Largest row tile <= tm_max, but keep >=2 grid steps when N allows
    (so v7x's two TensorCores are both used)."""
    if n_pad8 < 16:
        return n_pad8
    return min(tm_max, _round_up(pl.cdiv(n_pad8, 2), 8))


def hetegraphrec_node_embedding(nodes_embeds, weight, bias, weight2, *, tm_max=512):
    """relu(nodes_embeds @ weight + bias) @ weight2, fused in one Pallas kernel."""
    n, d_in = nodes_embeds.shape
    d_in_w, hidden = weight.shape
    hidden_w, d_out = weight2.shape
    assert d_in == d_in_w and hidden == hidden_w and bias.shape == (hidden,)

    # Row tiling: pad N to the chosen tile so any node count works.
    n_pad8 = _round_up(n, 8)
    tm = _pick_tm(n_pad8, tm_max)
    n_padded = _round_up(n, tm)
    grid = n_padded // tm

    # Lane-dense output: pad output columns to a multiple of 128.
    d_out_pad = _round_up(d_out, 128)

    # bf16 operands (halve HBM reads, bf16 MXU path); bias stays f32.
    x = jnp.pad(nodes_embeds, ((0, n_padded - n), (0, 0))).astype(jnp.bfloat16)
    w1 = weight.astype(jnp.bfloat16)
    b1 = bias.reshape(1, hidden).astype(jnp.float32)
    w2 = jnp.pad(weight2, ((0, 0), (0, d_out_pad - d_out))).astype(jnp.bfloat16)

    out = pl.pallas_call(
        _mlp_kernel,
        out_shape=jax.ShapeDtypeStruct((n_padded, d_out_pad), jnp.float32),
        grid_spec=pltpu.PrefetchScalarGridSpec(
            num_scalar_prefetch=0,
            grid=(grid,),
            in_specs=[
                pl.BlockSpec((tm, d_in), lambda i: (i, 0)),          # x tile over nodes
                pl.BlockSpec((d_in, hidden), lambda i: (0, 0)),      # W1 full, resident
                pl.BlockSpec((1, hidden), lambda i: (0, 0)),         # b1 full, resident
                pl.BlockSpec((hidden, d_out_pad), lambda i: (0, 0)),  # W2 full, resident
            ],
            out_specs=pl.BlockSpec((tm, d_out_pad), lambda i: (i, 0)),
        ),
        compiler_params=pltpu.CompilerParams(
            dimension_semantics=("parallel",)),
    )(x, w1, b1, w2)

    # Strip the row / column padding.
    return out[:n, :d_out]


def _xavier_uniform(key, shape):
    fan_in, fan_out = shape
    bound = math.sqrt(6.0 / (fan_in + fan_out))
    return jax.random.uniform(key, shape, jnp.float32, -bound, bound)


if __name__ == "__main__":
    # Small, forward-consistent shapes.
    N = 16            # number of unique nodes (pos + sampled negatives); not tile-aligned by requirement
    INPUT_DIM = 32    # aggregator output feature dim
    HIDDEN_DIM = 32
    OUTPUT_DIM = 16

    key = jax.random.PRNGKey(0)
    k_x, k_w1, k_b1, k_w2 = jax.random.split(key, 4)

    # TODO(synk): graph negative-sampling / neighbor aggregation are host-side
    # Python (networkx + sampler); the aggregated node features are synthesized here.
    nodes_embeds = jax.random.normal(k_x, (N, INPUT_DIM), jnp.float32)

    # Deterministic parameter init matching the module's _init_weights_bias2:
    #   weight  : xavier_uniform(input_dim, hidden_dim)
    #   bias    : uniform(-stdv, stdv), stdv = 1/sqrt(hidden_dim)
    #   weight2 : xavier_uniform(hidden_dim, output_dim)
    weight = _xavier_uniform(k_w1, (INPUT_DIM, HIDDEN_DIM))
    stdv = 1.0 / math.sqrt(HIDDEN_DIM)
    bias = jax.random.uniform(k_b1, (HIDDEN_DIM,), jnp.float32, -stdv, stdv)
    weight2 = _xavier_uniform(k_w2, (HIDDEN_DIM, OUTPUT_DIM))

    out = hetegraphrec_node_embedding(nodes_embeds, weight, bias, weight2)
    out = jax.block_until_ready(out)
    assert out.shape == (N, OUTPUT_DIM)

    # Reference with the same bf16 operand quantization (f32 accumulate).
    x_q = nodes_embeds.astype(jnp.bfloat16).astype(jnp.float32)
    w1_q = weight.astype(jnp.bfloat16).astype(jnp.float32)
    w2_q = weight2.astype(jnp.bfloat16).astype(jnp.float32)
    ref_q = jnp.maximum(x_q @ w1_q + bias, 0.0) @ w2_q
    assert jnp.allclose(out, ref_q, atol=1e-2, rtol=1e-2)

    # Sanity vs. full-f32 reference (looser tolerance due to bf16 operands).
    ref_f32 = jnp.maximum(nodes_embeds @ weight + bias, 0.0) @ weight2
    assert jnp.allclose(out, ref_f32, atol=5e-2, rtol=5e-2)

    print("KERNEL_OK")
</pallas_src>

<mosaic_0001>
module attributes {stable_mosaic.version = 11 : i64} {
  func.func @_mlp_kernel(%arg0: i32, %arg1: memref<8x32xbf16, #tpu.memory_space<vmem>>, %arg2: memref<32x32xbf16, #tpu.memory_space<vmem>>, %arg3: memref<1x32xf32, #tpu.memory_space<vmem>>, %arg4: memref<32x128xbf16, #tpu.memory_space<vmem>>, %arg5: memref<8x128xf32, #tpu.memory_space<vmem>>) attributes {dimension_semantics = [#tpu.dimension_semantics<parallel>], iteration_bounds = array<i64: 2>, scalar_prefetch = 0 : i64, scratch_operands = 0 : i64, tpu.core_type = #tpu.core_type<tc>, window_params = [{transform_indices = @transform_0, window_bounds = array<i64: 8, 32>}, {pipeline_mode = #tpu.pipeline_mode<synchronous>, transform_indices = @transform_1, window_bounds = array<i64: 32, 32>}, {pipeline_mode = #tpu.pipeline_mode<synchronous>, transform_indices = @transform_2, window_bounds = array<i64: 1, 32>}, {pipeline_mode = #tpu.pipeline_mode<synchronous>, transform_indices = @transform_3, window_bounds = array<i64: 32, 128>}, {transform_indices = @transform_4, window_bounds = array<i64: 8, 128>}]} {
    %c0 = arith.constant 0 : index
    %c0_0 = arith.constant 0 : index
    %0 = vector.load %arg1[%c0, %c0_0] : memref<8x32xbf16, #tpu.memory_space<vmem>>, vector<8x32xbf16>
    %c0_1 = arith.constant 0 : index
    %c0_2 = arith.constant 0 : index
    %1 = vector.load %arg2[%c0_1, %c0_2] : memref<32x32xbf16, #tpu.memory_space<vmem>>, vector<32x32xbf16>
    %cst = arith.constant dense<0.000000e+00> : vector<8x32xf32>
    %2 = tpu.matmul %0, %1, %cst {dimension_numbers = #tpu.dot_dimension_numbers<[1], [0], [0], [1], [0, 0, 1, 1], [], []>} : vector<8x32xbf16>, vector<32x32xbf16>, vector<8x32xf32> -> vector<8x32xf32>
    %c0_3 = arith.constant 0 : index
    %c0_4 = arith.constant 0 : index
    %3 = vector.load %arg3[%c0_3, %c0_4] : memref<1x32xf32, #tpu.memory_space<vmem>>, vector<1x32xf32>
    %4 = vector.broadcast %3 : vector<1x32xf32> to vector<8x32xf32>
    %5 = arith.addf %2, %4 : vector<8x32xf32>
    %cst_5 = arith.constant 0.000000e+00 : f32
    %6 = vector.broadcast %cst_5 : f32 to vector<8x32xf32>
    %7 = arith.maximumf %5, %6 : vector<8x32xf32>
    %8 = arith.truncf %7 : vector<8x32xf32> to vector<8x32xbf16>
    %c0_6 = arith.constant 0 : index
    %c0_7 = arith.constant 0 : index
    %9 = vector.load %arg4[%c0_6, %c0_7] : memref<32x128xbf16, #tpu.memory_space<vmem>>, vector<32x128xbf16>
    %cst_8 = arith.constant dense<0.000000e+00> : vector<8x128xf32>
    %10 = tpu.matmul %8, %9, %cst_8 {dimension_numbers = #tpu.dot_dimension_numbers<[1], [0], [0], [1], [0, 0, 1, 1], [], []>} : vector<8x32xbf16>, vector<32x128xbf16>, vector<8x128xf32> -> vector<8x128xf32>
    %c0_9 = arith.constant 0 : index
    %c0_10 = arith.constant 0 : index
    %11 = vector.load %arg5[%c0_9, %c0_10] : memref<8x128xf32, #tpu.memory_space<vmem>>, vector<8x128xf32>
    tpu.vector_store %arg5[%c0_9, %c0_10], %10 {strides = array<i32>} : memref<8x128xf32, #tpu.memory_space<vmem>>, vector<8x128xf32>,
    return
  }
  func.func @transform_0(%arg0: i32) -> (i32, i32) {
    %c0_i32 = arith.constant 0 : i32
    %c0_i32_0 = arith.constant 0 : i32
    return %arg0, %c0_i32 : i32, i32
  }
  func.func @transform_1(%arg0: i32) -> (i32, i32) {
    %c0_i32 = arith.constant 0 : i32
    %c0_i32_0 = arith.constant 0 : i32
    %c0_i32_1 = arith.constant 0 : i32
    return %c0_i32, %c0_i32_0 : i32, i32
  }
  func.func @transform_2(%arg0: i32) -> (i32, i32) {
    %c0_i32 = arith.constant 0 : i32
    %c0_i32_0 = arith.constant 0 : i32
    %c0_i32_1 = arith.constant 0 : i32
    return %c0_i32, %c0_i32_0 : i32, i32
  }
  func.func @transform_3(%arg0: i32) -> (i32, i32) {
    %c0_i32 = arith.constant 0 : i32
    %c0_i32_0 = arith.constant 0 : i32
    %c0_i32_1 = arith.constant 0 : i32
    return %c0_i32, %c0_i32_0 : i32, i32
  }
  func.func @transform_4(%arg0: i32) -> (i32, i32) {
    %c0_i32 = arith.constant 0 : i32
    %c0_i32_0 = arith.constant 0 : i32
    return %arg0, %c0_i32 : i32, i32
  }
}

</mosaic_0001>

<bundles_post_ra>
// kernel: tpu_custom_call.1
= control target key start
LH: loop header
LB: loop body
LE: loop exit
PB: predicated region body
PF: predicated region fallthrough
CT: control target
= control target key end

     0   :  { %9 = vsyncpa [#allocation3], 0  ;;  %s1020_s0 = inlined_call_operand.hbm [shape: bf16[16,32], index: 0, kind: input, shape index: {}]   ;;  %s1021_s1 = inlined_call_operand.hbm [shape: bf16[32,32], index: 1, kind: input, shape index: {}]   ;;  %s1022_s2 = inlined_call_operand.vmem [shape: f32[1,32], index: 2, kind: input, shape index: {}]   ;;  %s1023_s3 = inlined_call_operand.hbm [shape: bf16[32,128], index: 3, kind: input, shape index: {}]   ;;  %s1024_s4 = inlined_call_operand.hbm [shape: f32[16,128], index: 4, kind: output, shape index: {}]  }
   0x1   :  { %11 = vsyncpa [#allocation3 + $0x1], 0 }
   0x2   :  { %12 = vsyncpa [#allocation6], 0 }
   0x3   :  { %13 = vsyncpa [#allocation4], 0 }
   0x4   :  { %15 = vsyncpa [#allocation4 + $0x1], 0  ;;  %s787_s15 = smov 0   ;;  %s789_s16 = smov 0  }
   0x5   :  { %s791_s17 = smov 0   ;;  %s793_s18 = smov 0  }
   0x6 LB: > { %s808_s19 = sadd.s32 4294967295, %s752_s18   ;;  %s476_s20 = sadd.s32 4294967294, %s752_s18   ;;  %s752_s18 = sphi %s793_s18, %s1044_s18   ;;  %s748_s17 = sphi %s791_s17, %s1043_s17   ;;  %s744_s16 = sphi %s789_s16, %s1042_s16   ;;  %s740_s15 = sphi %s787_s15, %s1041_s15  }
   0x7   : > { %p41_p0 = scmp.ne.s32.totalorder %s744_s16, %s740_s15  ;;  %p1025_p1 = scmp.eq.s32.totalorder %s808_s19, 0 }
   0x8   : > { %p134_p3 = scmp.eq.s32.totalorder %s476_s20, 1  ;;  %p477_p5 = scmp.ge.s32.totalorder %s752_s18, 1 }
   0x9   : > { %p817_p4 = por %p1025_p1, %p41_p0  ;;  %p141_p7 = scmp.lt.s32.totalorder %s752_s18, 3 }
   0xa   : > { %p822_p6 = por %p134_p3, %p41_p0  ;;  %s754_s24 = smov [#allocation5]  }
   0xb   : > { %s1028_s21 = scalar_select %p817_p4, 1, 0 }
   0xc   : > { %s1029_s22 = scalar_select %p822_p6, 1, 0 }
   0xd   : > { %p827_p8 = pnand %p477_p5, %p141_p7  ;;  %s153_s25 = sshll.u32 %s754_s24, 4  ;;  %s831_s25 = int_to_ptr.vmem [resolvable:$true] %s153_s25 }
   0xe   : > { %s755_s27 = smov [#allocation7]   ;;  %s596_s5 = scalar_lea.hbm %s1021_s1, 256 }
   0xf   : > { %p533_p9 = pneg %p827_p8  ;;  %s169_s28 = sshll.u32 %s755_s27, 4  ;;  %s842_s28 = int_to_ptr.vmem [resolvable:$true] %s169_s28 }
  0x10   : > { %p597_p12 = scmp.ne.s32.totalorder %s1021_s1, %s596_s5  ;;  %p603_p5 = scmp.lt.u32.totalorder %s596_s5, %s1021_s1 }
  0x11   : > { %p838_p11 = pnand %p533_p9, %p1025_p1 }
  0x13   : > { %p598_p13 = pneg %p838_p11 }
  0x15   : > { %p599_p0 = pnand %p598_p13, %p597_p12 }
  0x17   : > { %p600_p3 = pneg %p599_p0 }
  0x19   : > { %p605_p7 = pnand %p603_p5, %p600_p3 }
  0x1b   : > { %608 = shalt.err (!%p605_p7)
}
  0x1c   : > { %s609_s10 = scalar_lea.vmem %s831_s25, 256  ;;  %p617_p2 = scmp.lt.s32.totalorder %s831_s25, %s831_s25 }
  0x1d   : > { %p610_p9 = scmp.ne.s32.totalorder %s831_s25, %s609_s10  ;;  %p618_p12 = scmp.lt.s32.totalorder %s609_s10, %s609_s10 }
  0x1f   : > { %p612_p10 = pnand %p610_p9, %p598_p13  ;;  %p619_p0 = por %p618_p12, %p617_p2 }
  0x21   : > { %p613_p1 = pneg %p612_p10 }
  0x23   : > { %p620_p6 = pnand %p619_p0, %p613_p1 }
  0x25   : > { %623 = shalt.err (!%p620_p6)
}
  0x26   : > { %s756_s11 = smov 64   ;;  %s757_s12 = smov 4  }
  0x27   : > { %536 = dma.hbm_to_vmem [thread:$0]  (!%p838_p11), %s1021_s1, 256, %s831_s25, [#allocation6], %s756_s11, %s756_s11, %s757_s12  }
  0x28   : > { %s624_s27 = scalar_lea.hbm %s1023_s3, 256 }
  0x29   : > { %p625_p2 = scmp.ne.s32.totalorder %s1023_s3, %s624_s27  ;;  %p631_p10 = scmp.lt.u32.totalorder %s624_s27, %s1023_s3 }
  0x2b   : > { %p627_p1 = pnand %p625_p2, %p598_p13 }
  0x2d   : > { %p628_p6 = pneg %p627_p1 }
  0x2f   : > { %p633_p3 = pnand %p631_p10, %p628_p6 }
  0x31   : > { %636 = shalt.err (!%p633_p3)
}
  0x32   : > { %s637_s25 = scalar_lea.vmem %s842_s28, 256  ;;  %p645_p12 = scmp.lt.s32.totalorder %s842_s28, %s842_s28 }
  0x33   : > { %p638_p5 = scmp.ne.s32.totalorder %s842_s28, %s637_s25  ;;  %p646_p0 = scmp.lt.s32.totalorder %s637_s25, %s637_s25 }
  0x35   : > { %p640_p7 = pnand %p638_p5, %p598_p13  ;;  %p647_p2 = por %p646_p0, %p645_p12 }
  0x37   : > { %p641_p9 = pneg %p640_p7 }
  0x39   : > { %p648_p1 = pnand %p647_p2, %p641_p9 }
  0x3b   : > { %651 = shalt.err (!%p648_p1)
}
  0x3c   : > { %539 = dma.hbm_to_vmem [thread:$0]  (!%p838_p11), %s1023_s3, 256, %s842_s28, [#allocation6], %s756_s11, %s756_s11, %s757_s12  }
  0x3d   : > { %s897_s9 = sadd.s32 1, %s752_s18   ;;  %s28_s26 = sadd.s32 1, %s748_s17 }
  0x3e   : > { %s25_s10 = ssub.s32 %s752_s18, %s897_s9  ;;  %p35_p13 = scmp.ne.s32.totalorder %s748_s17, %s744_s16 }
  0x3f   : > { %p26_p6 = scmp.eq.s32.totalorder %s25_s10, 0  ;;  %p36_p10 = scmp.eq.s32.totalorder %s752_s18, 0 }
  0x40   : > { %p1032_p3 = scmp.eq.s32.totalorder %s808_s19, 1  ;;  %p550_p7 = scmp.lt.s32.totalorder %s752_s18, 2 }
  0x41   : > { %s913_s14 = scalar_select %p26_p6, %s748_s17, %s28_s26  }
  0x42   : > { %p907_p5 = por %p1032_p3, %p35_p13  ;;  %p37_p9 = por %p36_p10, %p35_p13 }
  0x43   : > { %s183_s20 = sand.u32 1, %s748_s17   ;;  %s482_s28 = sshll.u32 %s752_s18, 6 }
  0x44   : > { %s1033_s13 = scalar_select %p907_p5, 1, 0 }
  0x45   : > { %s481_s24 = sshll.u32 %s183_s20, 2  ;;  %s920_s27 = scalar_lea.hbm %s1020_s0, %s482_s28 }
  0x46   : > { %s187_s29 = scalar_lea.vmem [#allocation2], %s481_s24  ;;  %p924_p11 = pnand %p550_p7, %p37_p9 }
  0x47   : > { %s194_s30 = sshll.u32 %s187_s29, 4  ;;  %s184_s6 = scalar_lea.sflag [#allocation3], %s183_s20  ;;  %s922_s30 = int_to_ptr.vmem [resolvable:$true] %s194_s30 }
  0x48   : > { %s652_s25 = scalar_lea.hbm %s920_s27, 64  ;;  %p654_p0 = pneg %p924_p11 }
  0x49   : > { %p653_p12 = scmp.ne.s32.totalorder %s920_s27, %s652_s25  ;;  %s657_s26 = scalar_lea.hbm %s1020_s0, 128 }
  0x4a   : > { %p658_p13 = scmp.lt.u32.totalorder %s920_s27, %s1020_s0  ;;  %p659_p6 = scmp.lt.u32.totalorder %s657_s26, %s652_s25 }
  0x4b   : > { %p655_p2 = pnand %p654_p0, %p653_p12  ;;  %p661_p3 = scmp.lt.u32.totalorder %s652_s25, %s920_s27 }
  0x4c   : > { %p660_p10 = por %p659_p6, %p658_p13 }
  0x4d   : > { %p656_p1 = pneg %p655_p2 }
  0x4e   : > { %p662_p7 = por %p661_p3, %p660_p10 }
  0x50   : > { %p663_p9 = pnand %p662_p7, %p656_p1 }
  0x52   : > { %666 = shalt.err (!%p663_p9)
}
  0x53   : > { %s667_s20 = scalar_lea.vmem %s922_s30, 64  ;;  %s758_s28 = smov [#allocation2]  }
  0x54   : > { %p668_p12 = scmp.ne.s32.totalorder %s922_s30, %s667_s20  ;;  %s672_s11 = sshll.u32 %s758_s28, 4  ;;  %s673_s11 = int_to_ptr.vmem [resolvable:$false] %s672_s11 }
  0x55   : > { %s674_s12 = scalar_lea.vmem %s673_s11, 128  ;;  %p675_p4 = scmp.lt.s32.totalorder %s922_s30, %s673_s11 }
  0x56   : > { %p670_p2 = pnand %p668_p12, %p654_p0  ;;  %p676_p13 = scmp.lt.s32.totalorder %s674_s12, %s667_s20 }
  0x58   : > { %p671_p5 = pneg %p670_p2  ;;  %p677_p6 = por %p676_p13, %p675_p4 }
  0x5a   : > { %p678_p10 = pnand %p677_p6, %p671_p5 }
  0x5c   : > { %681 = shalt.err (!%p678_p10)
}
  0x5d   : > { %543 = dma.hbm_to_vmem [thread:$0]  (!%p924_p11), %s920_s27, 64, %s922_s30, %s184_s6  }
  0x5e   : > { %203 = sbr.rel (%p827_p8) target bundleno = 560 (0x230), region = 36  ;;  %s956_s29 = sand.u32 (!%p827_p8), 1, %s744_s16  }
  0x5f   : > { %s484_s25 = sshll.u32 (!%p827_p8), %s956_s29, 2  ;;  %s206_s7 = scalar_lea.sflag (!%p827_p8), [#allocation3], %s956_s29 }
  0x60   : > { %s209_s8 = scalar_lea.vmem (!%p827_p8), [#allocation2], %s484_s25  ;;  %p1035_p4 = scmp.ne.s32.totalorder (!%p827_p8), %s1028_s21, 0 }
  0x65   : > { %727 = dma.done.wait (%p1035_p4), %s206_s7, 64  }
  0x66   : > { %729 = vsyncadd (%p1035_p4), %s206_s7, 4294967232  ;;  %p1036_p5 = scmp.eq.s32.totalorder %s808_s19, 0 }
  0x68   : > { %731 = dma.done.wait (%p1036_p5), [#allocation6], 512   ;;  %p1037_p11 = pmov %p1036_p5 }
  0x69   : > { %v759_v0 = vmov 0.0   ;;  %vm760_vm0 = vmmov 0   ;;  %v592_v1 = vld [vmem:[#allocation5] sm:$0xff]   ;;  %v593_v2 = vld [vmem:[#allocation5 + $0x8] sm:$0xff]   ;;  %v243_v3 = vld [vmem:[%s209_s8] sm:$0xf] }
  0x6a   : > { %733 = vsyncadd (%p1037_p11), [#allocation6], 4294966784  ;;  %505 = vmatprep.subr.bf16.mxu0 %v759_v0  ;;  %509 = vmatprep.mubr.msk.bf16.mxu0 %vm760_vm0, %v759_v0  ;;  %vm267_vm1 = vcmask 261120   ;;  %v594_v4 = vld [vmem:[#allocation7] sm:$0xff]   ;;  %v595_v5 = vld [vmem:[#allocation7 + $0x8] sm:$0xff]   ;;  %s487_s27 = sshll.u32 %s956_s29, 3 }
  0x6b   : > { %513 = vmatprep.subr.bf16.mxu1 %v759_v0  ;;  %517 = vmatprep.mubr.msk.bf16.mxu1 %vm760_vm0, %v759_v0  ;;  %v488_v6 = vld [vmem:[%s1022_s2] ss:$0 sm:$0xff]  ;;  %s241_s30 = scalar_lea.vmem [#allocation8], %s487_s27  ;;  %s496_s6 = sshll.u32 %s808_s19, 7 }
  0x6c   : > { %506 = vmatpush3.bf16.msra.mxu0 %v592_v1  ;;  %514 = vmatpush3.bf16.msra.mxu1 %v594_v4  ;;  %s387_s5 = sshll.u32 %s241_s30, 4  ;;  %s978_s24 = scalar_lea.hbm %s1024_s4, %s496_s6  ;;  %s973_s5 = int_to_ptr.vmem [resolvable:$true] %s387_s5 }
  0x6d   : > { %507 = vmatprep.subr.bf16.mxu0 %v759_v0  ;;  %515 = vmatprep.subr.bf16.mxu1 %v759_v0  ;;  %s374_s20 = scalar_lea.sflag [#allocation4], %s956_s29  ;;  %s682_s28 = scalar_lea.vmem %s973_s5, 128 }
  0x6e   : > { %p683_p8 = scmp.ne.s32.totalorder %s973_s5, %s682_s28  ;;  %p1038_p0 = scmp.ne.s32.totalorder %s1033_s13, 0 }
  0x6f   : > { %s761_s19 = smov [#allocation8]  }
  0x70   : > { %508 = vmatpush3.bf16.msra.mxu0 %v593_v2  ;;  %516 = vmatpush3.bf16.msra.mxu1 %v595_v5  ;;  %p684_p1 = pnand %p683_p8, %p1038_p0  ;;  %s686_s11 = sshll.u32 %s761_s19, 4  ;;  %s687_s11 = int_to_ptr.vmem [resolvable:$false] %s686_s11 }
  0x71   : > { %s688_s12 = scalar_lea.vmem %s687_s11, 256  ;;  %p689_p7 = scmp.lt.s32.totalorder %s973_s5, %s687_s11 }
  0x72   : > { %p685_p3 = pneg %p684_p1  ;;  %p690_p9 = scmp.lt.s32.totalorder %s688_s12, %s682_s28 }
  0x73   : > { %510 = vmatmul.mubr.msk.bf16.vlgmr.msra.gmra.mrb[0].mxu0 %vm267_vm1, %v243_v3 }
  0x74   : > { %p691_p12 = por %p690_p9, %p689_p7 }
  0x76   : > { %p692_p2 = pnand %p691_p12, %p685_p3 }
 0x146   : > { %v305_v7 = vpop.f32.mrb[0].mxu0 }
 0x147   : > { %v306_v8 = vadd.f32 %v488_v6, %v305_v7  ;;  %v511_v9 = vpop.f32.mrb[1].mxu0 }
 0x148   : > { %v308_v10 = vpop.f32.mrb[2].mxu0 }
 0x149   : > { %v311_v11 = vmax.f32 %v306_v8, 0.0  ;;  %v512_v12 = vpop.f32.mrb[3].mxu0 }
 0x14b   : > { %v312_v13 = vpack.c.bf16 %v311_v11, %v311_v11 }
 0x14d   : > { %518 = vmatmul.mubr.msk.bf16.vlgmr.msra.gmra.mrb[0].mxu1 %vm267_vm1, %v312_v13 }
 0x220   : > { %v366_v14 = vpop.f32.mrb[0].mxu1 }
 0x221   : > { %372 = vst [vmem:[%s241_s30] sm:$0xff] %v366_v14  ;;  %v519_v15 = vpop.f32.mrb[1].mxu1 }
 0x222   : > { %v369_v16 = vpop.f32.mrb[2].mxu1 }
 0x223   : > { %695 = shalt.err (!%p692_p2)
}
 0x224   : > { %s696_s29 = scalar_lea.hbm %s978_s24, 128  ;;  %s700_s8 = scalar_lea.hbm %s1024_s4, 256 }
 0x225   : > { %p697_p13 = scmp.ne.s32.totalorder %s978_s24, %s696_s29  ;;  %p701_p4 = scmp.lt.u32.totalorder %s978_s24, %s1024_s4 }
 0x226   : > { %p702_p5 = scmp.lt.u32.totalorder %s700_s8, %s696_s29  ;;  %p704_p8 = scmp.lt.u32.totalorder %s696_s29, %s978_s24 }
 0x227   : > { %p698_p6 = pnand %p697_p13, %p1038_p0 }
 0x228   : > { %p703_p11 = por %p702_p5, %p701_p4 }
 0x229   : > { %p699_p10 = pneg %p698_p6 }
 0x22a   : > { %p705_p1 = por %p704_p8, %p703_p11 }
 0x22c   : > { %p706_p3 = pnand %p705_p1, %p699_p10 }
 0x22e   : > { %709 = shalt.err (!%p706_p3)
}
 0x22f   : > { %531 = dma.vmem_to_hbm [thread:$0]  (%p1038_p0), %s973_s5, 128, %s978_s24, %s374_s20   ;;  %v520_v17 = vpop.f32.mrb[3].mxu1 }
 0x230 PF: > { %s399_s27 = sand.u32 1, %s740_s15   ;;  %p1039_p7 = scmp.ne.s32.totalorder %s1029_s22, 0 }
 0x231   : > { %p1040_p9 = scmp.ge.s32.totalorder %s752_s18, 2  ;;  %s400_s30 = scalar_lea.sflag [#allocation4], %s399_s27 }
 0x233   : > { %p545_p12 = pnand %p1040_p9, %p1039_p7 }
 0x235   : > { %735 = dma.done.wait (!%p545_p12), %s400_s30, 128  }
 0x236   : > { %737 = vsyncadd (!%p545_p12), %s400_s30, 4294967168  ;;  %p18_p2 = scmp.ge.s32.totalorder %s897_s9, 4   ;;  %s1041_s15 = smov %s744_s16 }
 0x237   : > { %s1042_s16 = smov %s748_s17  ;;  %s1043_s17 = smov %s913_s14 }
 0x238   : > { %s1044_s18 = smov %s897_s9  ;;  %20 = sbr.rel (!%p18_p2) target bundleno = 6 (0x6), region = 89 }
 0x23f   :  { %405 = vsyncpa [#allocation3], 1 }
 0x240   :  { %407 = vsyncpa [#allocation3 + $0x1], 1 }
 0x241   :  { %408 = vsyncpa [#allocation6], 1 }
 0x242   :  { %409 = vsyncpa [#allocation4], 1 }
 0x243   :  { %411 = vsyncpa [#allocation4 + $0x1], 1 }

</bundles_post_ra>
